<compile_context>
chip_gen: v6e
topology: v6e:2x2x1
jax: 0.10.0
libtpu: 0.0.40
codegen_flags: <defaults>
</compile_context>

<pallas_src>
import functools

import jax
import jax.numpy as jnp
from jax.experimental import pallas as pl
from jax.experimental.pallas import tpu as pltpu

N_CHARGE = 80 * 2            # 160
N_ART_SRC = 21 * 2           # 42
N_ARTICLE = 90 * 2           # 180
N_FUSED = N_CHARGE + N_ART_SRC + N_ARTICLE   # 382
N_FUSED_PAD = 384                            # 3 * 128 (lane-dense)

_DEFAULT_VMEM_CAPACITY = 64 * 1024 * 1024    # conservative default (v7x per-TC)


def _round_up(x, m):
    return ((x + m - 1) // m) * m


def _round_down(x, m):
    return (x // m) * m


def _vmem_budget_bytes():
    """Generation-aware VMEM budget (~80% of capacity, capped at 100 MiB)."""
    capacity = _DEFAULT_VMEM_CAPACITY
    try:
        info = pltpu.get_tpu_info()
        capacity = int(getattr(info, "vmem_capacity_bytes", capacity) or capacity)
    except Exception:
        pass  # older JAX / non-TPU tracing: keep the conservative default
    return int(min(int(capacity * 0.8), 100 * 1024 * 1024))


def _pick_batch_tile(batch, hidden, h_itemsize, batch_tile, budget_bytes):
    """Largest batch tile (multiple of 16) whose pipeline fits the VMEM budget."""
    # Resident operands (single-buffered): bf16 weight + f32 bias.
    resident = hidden * N_FUSED_PAD * 2 + N_FUSED_PAD * 4
    # Per-batch-row cost: double-buffered h tile, double-buffered f32 out tile,
    # plus the in-kernel bf16 copy of the h tile.
    per_row = 2 * hidden * h_itemsize + 2 * N_FUSED_PAD * 4 + hidden * 2
    fit = (budget_bytes - resident) // per_row
    tb = min(batch_tile, max(16, _round_down(fit, 16)))
    tb = max(16, _round_down(tb, 16))
    if batch <= tb:
        # Single full-extent tile: always a legal block shape, no partial tile.
        return batch
    return tb


def _ljp_fused_kernel(h_ref, w_ref, b_ref, out_ref):
    """One fused linear head on the MXU.

    h_ref:   (TB, H)   f32 or bf16 batch tile
    w_ref:   (H, 384)  bfloat16   (resident across the grid)
    b_ref:   (1, 384)  float32    (resident across the grid)
    out_ref: (TB, 384) float32
    """
    h_bf16 = h_ref[...].astype(jnp.bfloat16)     # no-op if h is already bf16
    out_ref[...] = (
        jnp.dot(h_bf16, w_ref[...], preferred_element_type=jnp.float32)
        + b_ref[...]
    )


def prepare_fused_params(params):
    """One-time param prep: concat + pad the three heads to (H, 384); bf16 weight."""
    w = jnp.concatenate(
        [params["w_charge"], params["w_article_source"], params["w_article"]],
        axis=1,
    )                                              # (H, 382)
    b = jnp.concatenate(
        [params["b_charge"], params["b_article_source"], params["b_article"]],
        axis=0,
    )                                              # (382,)
    hidden = w.shape[0]
    pad = N_FUSED_PAD - N_FUSED                    # 2 zero columns
    w = jnp.pad(w, ((0, 0), (0, pad))).astype(jnp.bfloat16)          # (H, 384)
    b = jnp.pad(b, ((0, pad),)).reshape(1, -1).astype(jnp.float32)   # (1, 384)
    assert w.shape == (hidden, N_FUSED_PAD)
    return {"w_fused": w, "b_fused": b}


@functools.partial(jax.jit, static_argnames=("batch_tile", "single_buffer_resident"))
def _ljp_forward_impl(h, w, b, *, batch_tile, single_buffer_resident):
    batch, hidden = h.shape
    budget = _vmem_budget_bytes()
    tb = _pick_batch_tile(batch, hidden, h.dtype.itemsize, batch_tile, budget)
    grid = (pl.cdiv(batch, tb),)

    # Resident operands: the block index never changes, so one buffer suffices.
    resident_mode = {}
    if single_buffer_resident:
        resident_mode = dict(pipeline_mode=pl.Buffered(1))

    cost = pl.CostEstimate(
        flops=2 * batch * hidden * N_FUSED_PAD,
        transcendentals=0,
        bytes_accessed=(batch * hidden * h.dtype.itemsize      # h read
                        + hidden * N_FUSED_PAD * 2              # bf16 weight read
                        + N_FUSED_PAD * 4                       # bias read
                        + batch * N_FUSED_PAD * 4),             # f32 out write
    )

    out = pl.pallas_call(
        _ljp_fused_kernel,
        out_shape=jax.ShapeDtypeStruct((batch, N_FUSED_PAD), jnp.float32),
        grid=grid,
        in_specs=[
            pl.BlockSpec((tb, hidden), lambda i: (i, 0)),                 # h tile
            pl.BlockSpec((hidden, N_FUSED_PAD), lambda i: (0, 0),
                         **resident_mode),                                # weight
            pl.BlockSpec((1, N_FUSED_PAD), lambda i: (0, 0),
                         **resident_mode),                                # bias
        ],
        out_specs=pl.BlockSpec((tb, N_FUSED_PAD), lambda i: (i, 0)),
        compiler_params=pltpu.CompilerParams(
            dimension_semantics=("parallel",),     # megacore hint; no-op 1-TC chips
            vmem_limit_bytes=budget,
        ),
        cost_estimate=cost,
    )(h, w, b)

    # Split heads (pad columns 382:384 are dropped before the view so the head
    # splits stay aligned), then the PyTorch .view(batch, -1, 2) reshapes.
    charge = out[:, 0:N_CHARGE]
    art_src = out[:, N_CHARGE:N_CHARGE + N_ART_SRC]
    article = out[:, N_CHARGE + N_ART_SRC:N_FUSED]
    return {
        "accuse": charge.reshape(batch, -1, 2),           # (B, 80, 2)
        "article": article.reshape(batch, -1, 2),         # (B, 90, 2)
        "article_source": art_src.reshape(batch, -1, 2),  # (B, 21, 2)
    }


_SINGLE_BUFFER_RESIDENT_OK = None   # None = untested; True/False = cached result


def ljp_predictor_forward(h, fused_params, *, batch_tile=1024):
    """Fused LJPPredictor forward.

    h: (batch, hidden) float32 or bfloat16 (bf16 halves h's HBM traffic).
    fused_params: output of prepare_fused_params.
    Returns {'accuse': (B,80,2), 'article': (B,90,2), 'article_source': (B,21,2)}.
    """
    global _SINGLE_BUFFER_RESIDENT_OK
    w = fused_params["w_fused"]
    b = fused_params["b_fused"]
    if _SINGLE_BUFFER_RESIDENT_OK is None:
        try:
            out = _ljp_forward_impl(h, w, b, batch_tile=batch_tile,
                                    single_buffer_resident=True)
            _SINGLE_BUFFER_RESIDENT_OK = True
            return out
        except Exception:
            # Pallas build without pipeline_mode=pl.Buffered support: fall back
            # to default double buffering of the resident weight/bias.
            _SINGLE_BUFFER_RESIDENT_OK = False
    return _ljp_forward_impl(h, w, b, batch_tile=batch_tile,
                             single_buffer_resident=_SINGLE_BUFFER_RESIDENT_OK)


def init_params(key, hidden_size):
    """Deterministic synthetic parameter init (matches nn.Linear shapes)."""
    ks = jax.random.split(key, 6)
    scale = 1.0 / jnp.sqrt(jnp.float32(hidden_size))

    def uni(k, shape):
        return jax.random.uniform(k, shape, jnp.float32, -scale, scale)

    return {
        "w_charge": uni(ks[0], (hidden_size, N_CHARGE)),
        "b_charge": uni(ks[1], (N_CHARGE,)),
        "w_article_source": uni(ks[2], (hidden_size, N_ART_SRC)),
        "b_article_source": uni(ks[3], (N_ART_SRC,)),
        "w_article": uni(ks[4], (hidden_size, N_ARTICLE)),
        "b_article": uni(ks[5], (N_ARTICLE,)),
    }


if __name__ == "__main__":
    batch = 2
    hidden_size = 32

    key = jax.random.PRNGKey(0)
    k_h, k_p = jax.random.split(key)
    h = jax.random.normal(k_h, (batch, hidden_size), dtype=jnp.float32)
    params = init_params(k_p, hidden_size)
    fused = prepare_fused_params(params)

    out = ljp_predictor_forward(h, fused)
    jax.block_until_ready(out)

    # Reference A: same math as nn.Linear, evaluated with the same bf16-input /
    # f32-accumulate contraction the kernel uses (tight tolerance).
    def ref_head(w, b):
        y = jnp.dot(h.astype(jnp.bfloat16), w.astype(jnp.bfloat16),
                    preferred_element_type=jnp.float32) + b
        return y.reshape(batch, -1, 2)

    ref_charge = ref_head(params["w_charge"], params["b_charge"])
    ref_src = ref_head(params["w_article_source"], params["b_article_source"])
    ref_article = ref_head(params["w_article"], params["b_article"])

    # Reference B: full-f32 math (loose tolerance covers the bf16 input cast).
    ref_charge_f32 = (h @ params["w_charge"] + params["b_charge"]).reshape(batch, -1, 2)

    assert out["accuse"].shape == (batch, 80, 2)
    assert out["article_source"].shape == (batch, 21, 2)
    assert out["article"].shape == (batch, 90, 2)
    assert jnp.allclose(out["accuse"], ref_charge, atol=1e-4, rtol=1e-4)
    assert jnp.allclose(out["article_source"], ref_src, atol=1e-4, rtol=1e-4)
    assert jnp.allclose(out["article"], ref_article, atol=1e-4, rtol=1e-4)
    assert jnp.allclose(out["accuse"], ref_charge_f32, atol=1e-1, rtol=1e-1)

    print("KERNEL_OK")
</pallas_src>

<mosaic_0001>
module attributes {stable_mosaic.version = 11 : i64} {
  func.func @_ljp_fused_kernel(%arg0: i32, %arg1: memref<2x32xf32, #tpu.memory_space<vmem>>, %arg2: memref<32x384xbf16, #tpu.memory_space<vmem>>, %arg3: memref<1x384xf32, #tpu.memory_space<vmem>>, %arg4: memref<2x384xf32, #tpu.memory_space<vmem>>) attributes {dimension_semantics = [#tpu.dimension_semantics<parallel>], iteration_bounds = array<i64: 1>, scalar_prefetch = 0 : i64, scratch_operands = 0 : i64, tpu.core_type = #tpu.core_type<tc>, window_params = [{transform_indices = @transform_0, window_bounds = array<i64: 2, 32>}, {pipeline_mode = #tpu.pipeline_mode<synchronous>, transform_indices = @transform_1, window_bounds = array<i64: 32, 384>}, {pipeline_mode = #tpu.pipeline_mode<synchronous>, transform_indices = @transform_2, window_bounds = array<i64: 1, 384>}, {transform_indices = @transform_3, window_bounds = array<i64: 2, 384>}]} {
    %c0 = arith.constant 0 : index
    %c0_0 = arith.constant 0 : index
    %0 = vector.load %arg1[%c0, %c0_0] : memref<2x32xf32, #tpu.memory_space<vmem>>, vector<2x32xf32>
    %1 = arith.truncf %0 : vector<2x32xf32> to vector<2x32xbf16>
    %c0_1 = arith.constant 0 : index
    %c0_2 = arith.constant 0 : index
    %2 = vector.load %arg2[%c0_1, %c0_2] : memref<32x384xbf16, #tpu.memory_space<vmem>>, vector<32x384xbf16>
    %cst = arith.constant dense<0.000000e+00> : vector<2x384xf32>
    %3 = tpu.matmul %1, %2, %cst {dimension_numbers = #tpu.dot_dimension_numbers<[1], [0], [0], [1], [0, 0, 1, 1], [], []>} : vector<2x32xbf16>, vector<32x384xbf16>, vector<2x384xf32> -> vector<2x384xf32>
    %c0_3 = arith.constant 0 : index
    %c0_4 = arith.constant 0 : index
    %4 = vector.load %arg3[%c0_3, %c0_4] : memref<1x384xf32, #tpu.memory_space<vmem>>, vector<1x384xf32>
    %5 = vector.broadcast %4 : vector<1x384xf32> to vector<2x384xf32>
    %6 = arith.addf %3, %5 : vector<2x384xf32>
    %c0_5 = arith.constant 0 : index
    %c0_6 = arith.constant 0 : index
    %7 = vector.load %arg4[%c0_5, %c0_6] : memref<2x384xf32, #tpu.memory_space<vmem>>, vector<2x384xf32>
    tpu.vector_store %arg4[%c0_5, %c0_6], %6 {strides = array<i32>} : memref<2x384xf32, #tpu.memory_space<vmem>>, vector<2x384xf32>,
    return
  }
  func.func @transform_0(%arg0: i32) -> (i32, i32) {
    %c0_i32 = arith.constant 0 : i32
    %c0_i32_0 = arith.constant 0 : i32
    return %arg0, %c0_i32 : i32, i32
  }
  func.func @transform_1(%arg0: i32) -> (i32, i32) {
    %c0_i32 = arith.constant 0 : i32
    %c0_i32_0 = arith.constant 0 : i32
    %c0_i32_1 = arith.constant 0 : i32
    return %c0_i32, %c0_i32_0 : i32, i32
  }
  func.func @transform_2(%arg0: i32) -> (i32, i32) {
    %c0_i32 = arith.constant 0 : i32
    %c0_i32_0 = arith.constant 0 : i32
    %c0_i32_1 = arith.constant 0 : i32
    return %c0_i32, %c0_i32_0 : i32, i32
  }
  func.func @transform_3(%arg0: i32) -> (i32, i32) {
    %c0_i32 = arith.constant 0 : i32
    %c0_i32_0 = arith.constant 0 : i32
    return %arg0, %c0_i32 : i32, i32
  }
}

module attributes {stable_mosaic.version = 11 : i64} {
  func.func @_ljp_fused_kernel(%arg0: i32, %arg1: memref<2x32xf32, #tpu.memory_space<vmem>>, %arg2: memref<32x384xbf16, #tpu.memory_space<vmem>>, %arg3: memref<1x384xf32, #tpu.memory_space<vmem>>, %arg4: memref<2x384xf32, #tpu.memory_space<vmem>>) attributes {dimension_semantics = [#tpu.dimension_semantics<parallel>], iteration_bounds = array<i64: 1>, scalar_prefetch = 0 : i64, scratch_operands = 0 : i64, tpu.core_type = #tpu.core_type<tc>, window_params = [{transform_indices = @transform_0, window_bounds = array<i64: 2, 32>}, {pipeline_mode = #tpu.pipeline_mode<synchronous>, transform_indices = @transform_1, window_bounds = array<i64: 32, 384>}, {pipeline_mode = #tpu.pipeline_mode<synchronous>, transform_indices = @transform_2, window_bounds = array<i64: 1, 384>}, {transform_indices = @transform_3, window_bounds = array<i64: 2, 384>}]} {
    %c0 = arith.constant 0 : index
    %c0_0 = arith.constant 0 : index
    %0 = vector.load %arg1[%c0, %c0_0] : memref<2x32xf32, #tpu.memory_space<vmem>>, vector<2x32xf32>
    %1 = arith.truncf %0 : vector<2x32xf32> to vector<2x32xbf16>
    %c0_1 = arith.constant 0 : index
    %c0_2 = arith.constant 0 : index
    %2 = vector.load %arg2[%c0_1, %c0_2] : memref<32x384xbf16, #tpu.memory_space<vmem>>, vector<32x384xbf16>
    %cst = arith.constant dense<0.000000e+00> : vector<2x384xf32>
    %3 = tpu.matmul %1, %2, %cst {dimension_numbers = #tpu.dot_dimension_numbers<[1], [0], [0], [1], [0, 0, 1, 1], [], []>} : vector<2x32xbf16>, vector<32x384xbf16>, vector<2x384xf32> -> vector<2x384xf32>
    %c0_3 = arith.constant 0 : index
    %c0_4 = arith.constant 0 : index
    %4 = vector.load %arg3[%c0_3, %c0_4] : memref<1x384xf32, #tpu.memory_space<vmem>>, vector<1x384xf32>
    %5 = vector.broadcast %4 : vector<1x384xf32> to vector<2x384xf32>
    %6 = arith.addf %3, %5 : vector<2x384xf32>
    %c0_5 = arith.constant 0 : index
    %c0_6 = arith.constant 0 : index
    %7 = vector.load %arg4[%c0_5, %c0_6] : memref<2x384xf32, #tpu.memory_space<vmem>>, vector<2x384xf32>
    tpu.vector_store %arg4[%c0_5, %c0_6], %6 {strides = array<i32>} : memref<2x384xf32, #tpu.memory_space<vmem>>, vector<2x384xf32>,
    return
  }
  func.func @transform_0(%arg0: i32) -> (i32, i32) {
    %c0_i32 = arith.constant 0 : i32
    %c0_i32_0 = arith.constant 0 : i32
    return %arg0, %c0_i32 : i32, i32
  }
  func.func @transform_1(%arg0: i32) -> (i32, i32) {
    %c0_i32 = arith.constant 0 : i32
    %c0_i32_0 = arith.constant 0 : i32
    %c0_i32_1 = arith.constant 0 : i32
    return %c0_i32, %c0_i32_0 : i32, i32
  }
  func.func @transform_2(%arg0: i32) -> (i32, i32) {
    %c0_i32 = arith.constant 0 : i32
    %c0_i32_0 = arith.constant 0 : i32
    %c0_i32_1 = arith.constant 0 : i32
    return %c0_i32, %c0_i32_0 : i32, i32
  }
  func.func @transform_3(%arg0: i32) -> (i32, i32) {
    %c0_i32 = arith.constant 0 : i32
    %c0_i32_0 = arith.constant 0 : i32
    return %arg0, %c0_i32 : i32, i32
  }
}

</mosaic_0001>

<bundles_post_ra>
// kernel: _ljp_forward_impl.1
= control target key start
LH: loop header
LB: loop body
LE: loop exit
PB: predicated region body
PF: predicated region fallthrough
CT: control target
= control target key end

     0   :  { %8 = vsyncpa [#allocation3], 0  ;;  %s331_s0 = inlined_call_operand.hbm [shape: f32[2,32], index: 0, kind: input, shape index: {}]   ;;  %s332_s1 = inlined_call_operand.hbm [shape: bf16[32,384], index: 1, kind: input, shape index: {}]   ;;  %s333_s2 = inlined_call_operand.vmem [shape: f32[1,384], index: 2, kind: input, shape index: {}]   ;;  %s334_s3 = inlined_call_operand.vmem [shape: f32[2,384], index: 3, kind: output, shape index: {}]  }
   0x1   :  { %9 = vsyncpa [#allocation5], 0  ;;  %s291_s12 = smov [#allocation2]   ;;  %s292_s14 = smov [#allocation4]  }
   0x2   :  { %s16_s13 = sshll.u32 %s291_s12, 4  ;;  %s25_s15 = sshll.u32 %s292_s14, 4  ;;  %s17_s13 = int_to_ptr.vmem [resolvable:$true] %s16_s13  ;;  %s26_s15 = int_to_ptr.vmem [resolvable:$true] %s25_s15 }
   0x3   :  { %s255_s16 = scalar_lea.vmem %s17_s13, 32  ;;  %p260_p1 = scmp.lt.s32.totalorder %s17_s13, %s17_s13 }
   0x4   :  { %p256_p0 = scmp.ne.s32.totalorder %s17_s13, %s255_s16  ;;  %p261_p2 = scmp.lt.s32.totalorder %s255_s16, %s255_s16 }
   0x6   :  { %p262_p3 = por %p261_p2, %p260_p1 }
   0x8   :  { %p263_p4 = pnand %p262_p3, %p256_p0 }
   0xa   :  { %266 = shalt.err (!%p263_p4)
}
   0xb   :  { %19 = dma.hbm_to_vmem [thread:$0]  %s331_s0, 32, %s17_s13, [#allocation3]  }
   0xc   :  { %s275_s19 = scalar_lea.vmem %s26_s15, 768  ;;  %p280_p6 = scmp.lt.s32.totalorder %s26_s15, %s26_s15 }
   0xd   :  { %p276_p5 = scmp.ne.s32.totalorder %s26_s15, %s275_s19  ;;  %p281_p7 = scmp.lt.s32.totalorder %s275_s19, %s275_s19 }
   0xf   :  { %p282_p8 = por %p281_p7, %p280_p6 }
  0x11   :  { %p283_p9 = pnand %p282_p8, %p276_p5 }
  0x13   :  { %286 = shalt.err (!%p283_p9)
}
  0x14   :  { %s293_s20 = smov 192   ;;  %s294_s21 = smov 12  }
  0x15   :  { %31 = dma.hbm_to_vmem [thread:$0]  %s332_s1, 768, %s26_s15, [#allocation5], %s293_s20, %s293_s20, %s294_s21  }
  0x16   :  { %287 = dma.done.wait [#allocation3], 32  }
  0x17   :  { %288 = vsyncadd [#allocation3], 4294967264 }
  0x18   :  { %289 = dma.done.wait [#allocation5], 768  }
  0x19   :  { %290 = vsyncadd [#allocation5], 4294966528  ;;  %v295_v0 = vmov 0.0   ;;  %vm296_vm0 = vmmov 0   ;;  %v297_v1 = vmov 0   ;;  %vm100_vm1 = vcmask 261120  }
  0x1a   :  { %223 = vmatprep.subr.bf16.mxu1 %v295_v0  ;;  %227 = vmatprep.mubr.msk.bf16.mxu1 %vm296_vm0, %v295_v0  ;;  %v239_v2 = vld [vmem:[#allocation4 + $0x1c] ss:$12 sps:$4 sm:$0xff]   ;;  %v241_v3 = vld [vmem:[#allocation4 + $0x20] ss:$12 sps:$4 sm:$0xff]   ;;  %v242_v4 = vld [vmem:[#allocation4 + $0x18] ss:$12 sps:$4 sm:$0xff]   ;;  %v53_v10 = vlaneseq }
  0x1b   :  { %136 = vmatprep.mubr.bf16.mxu0 %v297_v1  ;;  %116 = vmatprep.subr.bf16.mxu0 %v239_v2  ;;  %v243_v5 = vld [vmem:[#allocation4 + $0x4] ss:$12 sps:$4 sm:$0xff]   ;;  %v245_v6 = vld [vmem:[#allocation4 + $0x8] ss:$12 sps:$4 sm:$0xff]   ;;  %v246_v7 = vld [vmem:[#allocation4] ss:$12 sps:$4 sm:$0xff]  }
  0x1c   :  { %224 = vmatpush3.bf16.msra.mxu1 %v241_v3  ;;  %117 = vmatpush1.bf16.msra.mxu0 %v242_v4  ;;  %v41_v8 = vld [vmem:[#allocation2] sm:$0x3]  ;;  %v54_v11 = vshrl.u32 %v53_v10, 7  ;;  %v298_v13 = vmov 1983009808  }
  0x1d   :  { %225 = vmatprep.subr.bf16.mxu1 %v295_v0  ;;  %118 = vmatprep.subr.bf16.mxu0 %v243_v5  ;;  %v42_v9 = vpack.c.bf16 %v41_v8, %v41_v8  ;;  %v190_v14 = vunpack.c.l.s4 %v298_v13  ;;  %v51_v17 = vld [vmem:[%s333_s2] sm:$0x7] }
  0x1e   :  { %v63_v12 = vsub.s32 2, %v54_v11  ;;  %v55_v15 = vsub.s32 0, %v54_v11  ;;  %v59_v16 = vsub.s32 1, %v54_v11 }
  0x1f   :  { %v191_v19 = vunpack.c.0.s8 %v190_v14 }
  0x20   :  { %226 = vmatpush3.bf16.msra.mxu1 %v245_v6  ;;  %119 = vmatpush1.bf16.msra.mxu0 %v246_v7  ;;  %v64_v18 = vrot.slane %v51_v17, %v63_v12  ;;  %v56_v21 = vrot.slane %v51_v17, %v55_v15  ;;  %v60_v22 = vrot.slane %v51_v17, %v59_v16 }
  0x21   :  { %v194_v25 = vsub.s32 %v191_v19, %v54_v11 }
  0x23   :  { %228 = vmatmul.mubr.msk.bf16.vlgmr.msra.gmra.mxu1 %vm100_vm1, %v42_v9  ;;  %218 = vmatmul.mubr.msk.bf16.vlgmr.msra.gmra.mxu0 %vm100_vm1, %v42_v9 }
  0xe3   :  { %v179_v20 = vpop.f32.mrf.mxu1  ;;  %v138_v23 = vpop.f32.mrf.mxu0 }
  0xe4   :  { %v180_v24 = vadd.f32 %v179_v20, %v64_v18  ;;  %v139_v28 = vadd.f32 %v138_v23, %v56_v21 }
  0xe5   :  { %v229_v26 = vpop.f32.mrf.mxu1  ;;  %v140_v27 = vpop.f32.mrf.mxu0 }
  0xe6   :  { %v141_v29 = vadd.f32 %v140_v27, %v60_v22  ;;  %v202_v32 = vrot.slane %v180_v24, %v194_v25 }
  0xe7   :  { %v182_v30 = vpop.f32.mrf.mxu1  ;;  %v142_v31 = vpop.f32.mrf.mxu0 }
  0xe8   :  { %v188_v33 = vcombine.low %v139_v28, %v141_v29 }
  0xe9   :  { %v230_v34 = vpop.f32.mrf.mxu1  ;;  %v143_v35 = vpop.f32.mrf.mxu0 }
  0xea   :  { %v195_v36 = vrot.slane %v188_v33, %v194_v25 }
  0xec   :  { %v203_v37 = vcombine.low %v195_v36, %v202_v32 }
  0xee   :  { %205 = vst [vmem:[%s334_s3] sm:$0x3f] %v203_v37 }
  0xef   :  { %210 = vsyncpa [#allocation3], 1 }
  0xf0   :  { %211 = vsyncpa [#allocation5], 1 }

// kernel: _ljp_forward_impl.1
= control target key start
LH: loop header
LB: loop body
LE: loop exit
PB: predicated region body
PF: predicated region fallthrough
CT: control target
= control target key end

     0   :  { %8 = vsyncpa [#allocation3], 0  ;;  %s331_s0 = inlined_call_operand.hbm [shape: f32[2,32], index: 0, kind: input, shape index: {}]   ;;  %s332_s1 = inlined_call_operand.hbm [shape: bf16[32,384], index: 1, kind: input, shape index: {}]   ;;  %s333_s2 = inlined_call_operand.vmem [shape: f32[1,384], index: 2, kind: input, shape index: {}]   ;;  %s334_s3 = inlined_call_operand.vmem [shape: f32[2,384], index: 3, kind: output, shape index: {}]  }
   0x1   :  { %9 = vsyncpa [#allocation5], 0  ;;  %s291_s12 = smov [#allocation2]   ;;  %s292_s14 = smov [#allocation4]  }
   0x2   :  { %s16_s13 = sshll.u32 %s291_s12, 4  ;;  %s25_s15 = sshll.u32 %s292_s14, 4  ;;  %s17_s13 = int_to_ptr.vmem [resolvable:$true] %s16_s13  ;;  %s26_s15 = int_to_ptr.vmem [resolvable:$true] %s25_s15 }
   0x3   :  { %s255_s16 = scalar_lea.vmem %s17_s13, 32  ;;  %p260_p1 = scmp.lt.s32.totalorder %s17_s13, %s17_s13 }
   0x4   :  { %p256_p0 = scmp.ne.s32.totalorder %s17_s13, %s255_s16  ;;  %p261_p2 = scmp.lt.s32.totalorder %s255_s16, %s255_s16 }
   0x6   :  { %p262_p3 = por %p261_p2, %p260_p1 }
   0x8   :  { %p263_p4 = pnand %p262_p3, %p256_p0 }
   0xa   :  { %266 = shalt.err (!%p263_p4)
}
   0xb   :  { %19 = dma.hbm_to_vmem [thread:$0]  %s331_s0, 32, %s17_s13, [#allocation3]  }
   0xc   :  { %s275_s19 = scalar_lea.vmem %s26_s15, 768  ;;  %p280_p6 = scmp.lt.s32.totalorder %s26_s15, %s26_s15 }
   0xd   :  { %p276_p5 = scmp.ne.s32.totalorder %s26_s15, %s275_s19  ;;  %p281_p7 = scmp.lt.s32.totalorder %s275_s19, %s275_s19 }
   0xf   :  { %p282_p8 = por %p281_p7, %p280_p6 }
  0x11   :  { %p283_p9 = pnand %p282_p8, %p276_p5 }
  0x13   :  { %286 = shalt.err (!%p283_p9)
}
  0x14   :  { %s293_s20 = smov 192   ;;  %s294_s21 = smov 12  }
  0x15   :  { %31 = dma.hbm_to_vmem [thread:$0]  %s332_s1, 768, %s26_s15, [#allocation5], %s293_s20, %s293_s20, %s294_s21  }
  0x16   :  { %287 = dma.done.wait [#allocation3], 32  }
  0x17   :  { %288 = vsyncadd [#allocation3], 4294967264 }
  0x18   :  { %289 = dma.done.wait [#allocation5], 768  }
  0x19   :  { %290 = vsyncadd [#allocation5], 4294966528  ;;  %v295_v0 = vmov 0.0   ;;  %vm296_vm0 = vmmov 0   ;;  %v297_v1 = vmov 0   ;;  %vm100_vm1 = vcmask 261120  }
  0x1a   :  { %223 = vmatprep.subr.bf16.mxu1 %v295_v0  ;;  %227 = vmatprep.mubr.msk.bf16.mxu1 %vm296_vm0, %v295_v0  ;;  %v239_v2 = vld [vmem:[#allocation4 + $0x1c] ss:$12 sps:$4 sm:$0xff]   ;;  %v241_v3 = vld [vmem:[#allocation4 + $0x20] ss:$12 sps:$4 sm:$0xff]   ;;  %v242_v4 = vld [vmem:[#allocation4 + $0x18] ss:$12 sps:$4 sm:$0xff]   ;;  %v53_v10 = vlaneseq }
  0x1b   :  { %136 = vmatprep.mubr.bf16.mxu0 %v297_v1  ;;  %116 = vmatprep.subr.bf16.mxu0 %v239_v2  ;;  %v243_v5 = vld [vmem:[#allocation4 + $0x4] ss:$12 sps:$4 sm:$0xff]   ;;  %v245_v6 = vld [vmem:[#allocation4 + $0x8] ss:$12 sps:$4 sm:$0xff]   ;;  %v246_v7 = vld [vmem:[#allocation4] ss:$12 sps:$4 sm:$0xff]  }
  0x1c   :  { %224 = vmatpush3.bf16.msra.mxu1 %v241_v3  ;;  %117 = vmatpush1.bf16.msra.mxu0 %v242_v4  ;;  %v41_v8 = vld [vmem:[#allocation2] sm:$0x3]  ;;  %v54_v11 = vshrl.u32 %v53_v10, 7  ;;  %v298_v13 = vmov 1983009808  }
  0x1d   :  { %225 = vmatprep.subr.bf16.mxu1 %v295_v0  ;;  %118 = vmatprep.subr.bf16.mxu0 %v243_v5  ;;  %v42_v9 = vpack.c.bf16 %v41_v8, %v41_v8  ;;  %v190_v14 = vunpack.c.l.s4 %v298_v13  ;;  %v51_v17 = vld [vmem:[%s333_s2] sm:$0x7] }
  0x1e   :  { %v63_v12 = vsub.s32 2, %v54_v11  ;;  %v55_v15 = vsub.s32 0, %v54_v11  ;;  %v59_v16 = vsub.s32 1, %v54_v11 }
  0x1f   :  { %v191_v19 = vunpack.c.0.s8 %v190_v14 }
  0x20   :  { %226 = vmatpush3.bf16.msra.mxu1 %v245_v6  ;;  %119 = vmatpush1.bf16.msra.mxu0 %v246_v7  ;;  %v64_v18 = vrot.slane %v51_v17, %v63_v12  ;;  %v56_v21 = vrot.slane %v51_v17, %v55_v15  ;;  %v60_v22 = vrot.slane %v51_v17, %v59_v16 }
  0x21   :  { %v194_v25 = vsub.s32 %v191_v19, %v54_v11 }
  0x23   :  { %228 = vmatmul.mubr.msk.bf16.vlgmr.msra.gmra.mxu1 %vm100_vm1, %v42_v9  ;;  %218 = vmatmul.mubr.msk.bf16.vlgmr.msra.gmra.mxu0 %vm100_vm1, %v42_v9 }
  0xe3   :  { %v179_v20 = vpop.f32.mrf.mxu1  ;;  %v138_v23 = vpop.f32.mrf.mxu0 }
  0xe4   :  { %v180_v24 = vadd.f32 %v179_v20, %v64_v18  ;;  %v139_v28 = vadd.f32 %v138_v23, %v56_v21 }
  0xe5   :  { %v229_v26 = vpop.f32.mrf.mxu1  ;;  %v140_v27 = vpop.f32.mrf.mxu0 }
  0xe6   :  { %v141_v29 = vadd.f32 %v140_v27, %v60_v22  ;;  %v202_v32 = vrot.slane %v180_v24, %v194_v25 }
  0xe7   :  { %v182_v30 = vpop.f32.mrf.mxu1  ;;  %v142_v31 = vpop.f32.mrf.mxu0 }
  0xe8   :  { %v188_v33 = vcombine.low %v139_v28, %v141_v29 }
  0xe9   :  { %v230_v34 = vpop.f32.mrf.mxu1  ;;  %v143_v35 = vpop.f32.mrf.mxu0 }
  0xea   :  { %v195_v36 = vrot.slane %v188_v33, %v194_v25 }
  0xec   :  { %v203_v37 = vcombine.low %v195_v36, %v202_v32 }
  0xee   :  { %205 = vst [vmem:[%s334_s3] sm:$0x3f] %v203_v37 }
  0xef   :  { %210 = vsyncpa [#allocation3], 1 }
  0xf0   :  { %211 = vsyncpa [#allocation5], 1 }

</bundles_post_ra>
